<compile_context>
chip_gen: v7x
topology: tpu7x:2x2x1
jax: 0.10.0
libtpu: 0.0.40
codegen_flags: <defaults>
</compile_context>

<pallas_src>
import functools

import jax
import jax.numpy as jnp
from jax.experimental import pallas as pl
from jax.experimental.pallas import tpu as pltpu


def _channel_att_kernel(x_ref, w1_ref, b1_ref, w2_ref, b2_ref, o_ref, *, inv_hw):
    # Global average pool over the spatial (lane) axis, accumulated in f32
    # without keeping a full f32 copy of the block alive. inv_hw = 1/(H*W).
    pooled = jnp.sum(x_ref[...], axis=-1, dtype=jnp.float32) * inv_hw   # (Bt, C)

    # Squeeze-excite MLP on the MXU (hidden dim zero-padded to 128 lanes,
    # batched over Bt so the matmuls are not M=1). All math in f32.
    z1 = jnp.dot(pooled, w1_ref[...],
                 preferred_element_type=jnp.float32) + b1_ref[...]      # (Bt, Hp)
    z1 = jnp.maximum(z1, 0.0)
    z2 = jnp.dot(z1, w2_ref[...],
                 preferred_element_type=jnp.float32) + b2_ref[...]      # (Bt, C)
    gate = jax.nn.sigmoid(z2)                                           # (Bt, C)

    # Per-channel scale: re-read x (cheap: 3 vld slots/cycle) and multiply in
    # the I/O dtype -> bf16 VALU on v6e/v7x, no f32 block-sized temp.
    o_ref[...] = (x_ref[...] * gate.astype(x_ref.dtype)[:, :, None]).astype(o_ref.dtype)


def _vmem_budget():
    """Generation-aware (target block bytes, vmem_limit cap, force >=2 grid pts)."""
    try:
        vmem_cap = int(pltpu.get_tpu_info().vmem_capacity_bytes)
    except Exception:
        vmem_cap = 64 << 20                      # conservative (v7x-safe) fallback
    if vmem_cap >= (96 << 20):                   # v5e / v6e: 128 MiB physical, 1 TC
        return 12 << 20, 100 << 20, False
    # v7x: 64 MiB physical per TC, 2 TCs -> keep >=2 grid points for megacore.
    return 6 << 20, 48 << 20, True


def channel_att_pallas(x_nchw, w1, b1, w2, b2, *, max_batch_tile=None):
    """x_nchw: (B, C, H, W), any float dtype (output keeps the input dtype).
    w1: (C, hidden), b1: (hidden,), w2: (hidden, C), b2: (C,)
    (Linear weights stored as (in_features, out_features))."""
    B, C, H, W = x_nchw.shape
    HW = H * W
    hidden = w1.shape[1]
    assert w2.shape == (hidden, C) and b1.shape == (hidden,) and b2.shape == (C,)

    io_dtype = x_nchw.dtype
    itemsize = jnp.dtype(io_dtype).itemsize

    # Hidden dim padded to a lane-dense multiple of 128 (zero weights/bias are
    # mathematically inert).  Works for hidden > 128 too.
    hid_pad = max(128, ((hidden + 127) // 128) * 128)

    # No spatial padding: the block carries the full (C, HW) extents, which is
    # legal for any HW (full-array last dims) and avoids extra HBM passes.
    x3 = x_nchw.reshape(B, C, HW)

    w1p = jnp.zeros((C, hid_pad), jnp.float32).at[:, :hidden].set(w1.astype(jnp.float32))
    b1p = jnp.zeros((1, hid_pad), jnp.float32).at[0, :hidden].set(b1.astype(jnp.float32))
    w2p = jnp.zeros((hid_pad, C), jnp.float32).at[:hidden, :].set(w2.astype(jnp.float32))
    b2p = b2.reshape(1, C).astype(jnp.float32)
    param_bytes = (w1p.size + b1p.size + w2p.size + b2p.size) * 4

    # ---- Batch tiling (generation-aware) -----------------------------------
    target_block, vmem_cap_limit, force_two = _vmem_budget()
    per_batch_io = C * HW * itemsize
    Bt = max(1, min(B, target_block // max(per_batch_io, 1)))
    if force_two and B >= 2:
        Bt = min(Bt, pl.cdiv(B, 2))              # >=2 grid points on v7x megacore
    if max_batch_tile is not None:
        Bt = max(1, min(Bt, int(max_batch_tile)))
    Bt = int(Bt)
    grid = (pl.cdiv(B, Bt),)                     # ragged last block OK (rows independent)

    block_io = Bt * C * HW * itemsize
    # 2x double-buffered input + 2x double-buffered output + I/O-dtype
    # intermediates + resident f32 params + slack.
    vmem_need = 6 * block_io + 2 * param_bytes + (2 << 20)
    vmem_limit = int(min(max(vmem_need, 32 << 20), vmem_cap_limit))

    # Advisory cost hint: this op is bandwidth-bound.
    cost = pl.CostEstimate(
        flops=int(2 * B * C * HW + 4 * B * C * hid_pad),
        transcendentals=int(B * C),
        bytes_accessed=int(2 * B * C * HW * itemsize + param_bytes),
    )

    kernel = functools.partial(_channel_att_kernel, inv_hw=1.0 / float(HW))

    out = pl.pallas_call(
        kernel,
        out_shape=jax.ShapeDtypeStruct((B, C, HW), io_dtype),
        grid_spec=pltpu.PrefetchScalarGridSpec(
            num_scalar_prefetch=0,
            grid=grid,
            in_specs=[
                pl.BlockSpec((Bt, C, HW), lambda g: (g, 0, 0)),
                # Params: constant index maps -> stay resident across grid steps.
                pl.BlockSpec((C, hid_pad), lambda g: (0, 0)),
                pl.BlockSpec((1, hid_pad), lambda g: (0, 0)),
                pl.BlockSpec((hid_pad, C), lambda g: (0, 0)),
                pl.BlockSpec((1, C), lambda g: (0, 0)),
            ],
            out_specs=pl.BlockSpec((Bt, C, HW), lambda g: (g, 0, 0)),
        ),
        compiler_params=pltpu.CompilerParams(
            dimension_semantics=("parallel",),   # batch axis shards across v7x TCs
            vmem_limit_bytes=vmem_limit,
        ),
        cost_estimate=cost,
    )(x3, w1p, b1p, w2p, b2p)

    return out.reshape(B, C, H, W)


def channel_att_ref(x, w1, b1, w2, b2):
    """Plain-JAX reference matching the PyTorch forward (compute in f32)."""
    xf = x.astype(jnp.float32)
    y = jnp.mean(xf, axis=(2, 3))                # (B, C)
    y = jnp.maximum(y @ w1 + b1, 0.0)            # (B, hidden)
    y = jax.nn.sigmoid(y @ w2 + b2)              # (B, C)
    return (xf * y[:, :, None, None]).astype(x.dtype)


if __name__ == "__main__":
    # Small shapes consistent with the module: reduction=32 -> need C >= 32.
    B, C, H, W = 2, 64, 16, 16
    reduction = 32
    hidden = C // reduction                      # = 2

    key = jax.random.PRNGKey(0)
    kx, k1, k2, k3, k4 = jax.random.split(key, 5)

    x = jax.random.normal(kx, (B, C, H, W), jnp.float32)
    # Deterministic synthetic parameters (Linear weights stored as (in, out)).
    w1 = jax.random.normal(k1, (C, hidden), jnp.float32) * 0.1
    b1 = jax.random.normal(k2, (hidden,), jnp.float32) * 0.1
    w2 = jax.random.normal(k3, (hidden, C), jnp.float32) * 0.1
    b2 = jax.random.normal(k4, (C,), jnp.float32) * 0.1

    # f32 path (128-aligned spatial size).
    out = jax.block_until_ready(channel_att_pallas(x, w1, b1, w2, b2))
    ref = channel_att_ref(x, w1, b1, w2, b2)
    assert out.shape == (B, C, H, W) and out.dtype == x.dtype
    assert jnp.allclose(out, ref, atol=1e-5, rtol=1e-5), "f32 mismatch vs reference"

    # bf16 I/O path (halves HBM traffic; pooling still accumulates in f32).
    xb = x.astype(jnp.bfloat16)
    outb = jax.block_until_ready(channel_att_pallas(xb, w1, b1, w2, b2))
    refb = channel_att_ref(xb, w1, b1, w2, b2)
    assert outb.dtype == jnp.bfloat16
    assert jnp.allclose(outb.astype(jnp.float32), refb.astype(jnp.float32),
                        atol=2e-2, rtol=2e-2), "bf16 mismatch vs reference"

    # Non-128-aligned spatial size (7x7 -> HW=49): full-extent last-dim block,
    # no pad/slice passes; guards the masked-lane reduce.
    x2 = jax.random.normal(kx, (2, 64, 7, 7), jnp.float32)
    out2 = jax.block_until_ready(channel_att_pallas(x2, w1, b1, w2, b2))
    ref2 = channel_att_ref(x2, w1, b1, w2, b2)
    assert jnp.allclose(out2, ref2, atol=1e-5, rtol=1e-5), "padded-HW mismatch"

    # Odd batch with forced small tile: exercises the ragged cdiv last block.
    x3 = jax.random.normal(kx, (3, 64, 7, 7), jnp.float32)
    out3 = jax.block_until_ready(channel_att_pallas(x3, w1, b1, w2, b2, max_batch_tile=2))
    ref3 = channel_att_ref(x3, w1, b1, w2, b2)
    assert jnp.allclose(out3, ref3, atol=1e-5, rtol=1e-5), "ragged-batch mismatch"

    print("KERNEL_OK")
</pallas_src>

<mosaic_0001>
module attributes {stable_mosaic.version = 11 : i64} {
  func.func @_channel_att_kernel(%arg0: i32, %arg1: memref<1x64x256xf32, #tpu.memory_space<vmem>>, %arg2: memref<64x128xf32, #tpu.memory_space<vmem>>, %arg3: memref<1x128xf32, #tpu.memory_space<vmem>>, %arg4: memref<128x64xf32, #tpu.memory_space<vmem>>, %arg5: memref<1x64xf32, #tpu.memory_space<vmem>>, %arg6: memref<1x64x256xf32, #tpu.memory_space<vmem>>) attributes {dimension_semantics = [#tpu.dimension_semantics<parallel>], iteration_bounds = array<i64: 2>, scalar_prefetch = 0 : i64, scratch_operands = 0 : i64, tpu.core_type = #tpu.core_type<tc>, window_params = [{transform_indices = @transform_0, window_bounds = array<i64: 1, 64, 256>}, {pipeline_mode = #tpu.pipeline_mode<synchronous>, transform_indices = @transform_1, window_bounds = array<i64: 64, 128>}, {pipeline_mode = #tpu.pipeline_mode<synchronous>, transform_indices = @transform_2, window_bounds = array<i64: 1, 128>}, {pipeline_mode = #tpu.pipeline_mode<synchronous>, transform_indices = @transform_3, window_bounds = array<i64: 128, 64>}, {pipeline_mode = #tpu.pipeline_mode<synchronous>, transform_indices = @transform_4, window_bounds = array<i64: 1, 64>}, {transform_indices = @transform_5, window_bounds = array<i64: 1, 64, 256>}]} {
    %c0 = arith.constant 0 : index
    %c0_0 = arith.constant 0 : index
    %c0_1 = arith.constant 0 : index
    %0 = vector.load %arg1[%c0, %c0_0, %c0_1] : memref<1x64x256xf32, #tpu.memory_space<vmem>>, vector<1x64x256xf32>
    %cst = arith.constant dense<0.000000e+00> : vector<1x64xf32>
    %1 = vector.multi_reduction <add>, %0, %cst [2] : vector<1x64x256xf32> to vector<1x64xf32>
    %cst_2 = arith.constant 3.906250e-03 : f32
    %2 = vector.broadcast %cst_2 : f32 to vector<1x64xf32>
    %3 = arith.mulf %1, %2 : vector<1x64xf32>
    %c0_3 = arith.constant 0 : index
    %c0_4 = arith.constant 0 : index
    %4 = vector.load %arg2[%c0_3, %c0_4] : memref<64x128xf32, #tpu.memory_space<vmem>>, vector<64x128xf32>
    %cst_5 = arith.constant dense<0.000000e+00> : vector<1x128xf32>
    %5 = tpu.matmul %3, %4, %cst_5 {dimension_numbers = #tpu.dot_dimension_numbers<[1], [0], [0], [1], [0, 0, 1, 1], [], []>} : vector<1x64xf32>, vector<64x128xf32>, vector<1x128xf32> -> vector<1x128xf32>
    %c0_6 = arith.constant 0 : index
    %c0_7 = arith.constant 0 : index
    %6 = vector.load %arg3[%c0_6, %c0_7] : memref<1x128xf32, #tpu.memory_space<vmem>>, vector<1x128xf32>
    %7 = arith.addf %5, %6 : vector<1x128xf32>
    %cst_8 = arith.constant 0.000000e+00 : f32
    %8 = vector.broadcast %cst_8 : f32 to vector<1x128xf32>
    %9 = arith.maximumf %7, %8 : vector<1x128xf32>
    %c0_9 = arith.constant 0 : index
    %c0_10 = arith.constant 0 : index
    %10 = vector.load %arg4[%c0_9, %c0_10] : memref<128x64xf32, #tpu.memory_space<vmem>>, vector<128x64xf32>
    %cst_11 = arith.constant dense<0.000000e+00> : vector<1x64xf32>
    %11 = tpu.matmul %9, %10, %cst_11 {dimension_numbers = #tpu.dot_dimension_numbers<[1], [0], [0], [1], [0, 0, 1, 1], [], []>} : vector<1x128xf32>, vector<128x64xf32>, vector<1x64xf32> -> vector<1x64xf32>
    %c0_12 = arith.constant 0 : index
    %c0_13 = arith.constant 0 : index
    %12 = vector.load %arg5[%c0_12, %c0_13] : memref<1x64xf32, #tpu.memory_space<vmem>>, vector<1x64xf32>
    %13 = arith.addf %11, %12 : vector<1x64xf32>
    %14 = arith.negf %13 : vector<1x64xf32>
    %15 = math.exp %14 : vector<1x64xf32>
    %cst_14 = arith.constant 1.000000e+00 : f32
    %16 = vector.broadcast %cst_14 : f32 to vector<1x64xf32>
    %17 = arith.addf %16, %15 : vector<1x64xf32>
    %18 = arith.divf %16, %17 : vector<1x64xf32>
    %c0_15 = arith.constant 0 : index
    %c0_16 = arith.constant 0 : index
    %c0_17 = arith.constant 0 : index
    %19 = vector.load %arg1[%c0_15, %c0_16, %c0_17] : memref<1x64x256xf32, #tpu.memory_space<vmem>>, vector<1x64x256xf32>
    %20 = vector.shape_cast %18 : vector<1x64xf32> to vector<1x64x1xf32>
    %21 = vector.broadcast %20 : vector<1x64x1xf32> to vector<1x64x256xf32>
    %22 = arith.mulf %19, %21 : vector<1x64x256xf32>
    %c0_18 = arith.constant 0 : index
    %c0_19 = arith.constant 0 : index
    %c0_20 = arith.constant 0 : index
    %23 = vector.load %arg6[%c0_18, %c0_19, %c0_20] : memref<1x64x256xf32, #tpu.memory_space<vmem>>, vector<1x64x256xf32>
    tpu.vector_store %arg6[%c0_18, %c0_19, %c0_20], %22 {strides = array<i32>} : memref<1x64x256xf32, #tpu.memory_space<vmem>>, vector<1x64x256xf32>,
    return
  }
  func.func @transform_0(%arg0: i32) -> (i32, i32, i32) {
    %c0_i32 = arith.constant 0 : i32
    %c0_i32_0 = arith.constant 0 : i32
    %c0_i32_1 = arith.constant 0 : i32
    return %arg0, %c0_i32, %c0_i32_0 : i32, i32, i32
  }
  func.func @transform_1(%arg0: i32) -> (i32, i32) {
    %c0_i32 = arith.constant 0 : i32
    %c0_i32_0 = arith.constant 0 : i32
    %c0_i32_1 = arith.constant 0 : i32
    return %c0_i32, %c0_i32_0 : i32, i32
  }
  func.func @transform_2(%arg0: i32) -> (i32, i32) {
    %c0_i32 = arith.constant 0 : i32
    %c0_i32_0 = arith.constant 0 : i32
    %c0_i32_1 = arith.constant 0 : i32
    return %c0_i32, %c0_i32_0 : i32, i32
  }
  func.func @transform_3(%arg0: i32) -> (i32, i32) {
    %c0_i32 = arith.constant 0 : i32
    %c0_i32_0 = arith.constant 0 : i32
    %c0_i32_1 = arith.constant 0 : i32
    return %c0_i32, %c0_i32_0 : i32, i32
  }
  func.func @transform_4(%arg0: i32) -> (i32, i32) {
    %c0_i32 = arith.constant 0 : i32
    %c0_i32_0 = arith.constant 0 : i32
    %c0_i32_1 = arith.constant 0 : i32
    return %c0_i32, %c0_i32_0 : i32, i32
  }
  func.func @transform_5(%arg0: i32) -> (i32, i32, i32) {
    %c0_i32 = arith.constant 0 : i32
    %c0_i32_0 = arith.constant 0 : i32
    %c0_i32_1 = arith.constant 0 : i32
    return %arg0, %c0_i32, %c0_i32_0 : i32, i32, i32
  }
}

</mosaic_0001>

<bundles_post_ra>
// kernel: tpu_custom_call.1
= control target key start
LH: loop header
LB: loop body
LE: loop exit
PB: predicated region body
PF: predicated region fallthrough
CT: control target
= control target key end

     0   :  { %10 = vsyncpa [#allocation3], 0  ;;  %s1351_s0 = inlined_call_operand.hbm [shape: f32[2,64,256], index: 0, kind: input, shape index: {}]   ;;  %s1352_s1 = inlined_call_operand.vmem [shape: f32[64,128], index: 1, kind: input, shape index: {}]   ;;  %s1353_s2 = inlined_call_operand.vmem [shape: f32[1,128], index: 2, kind: input, shape index: {}]   ;;  %s1354_s3 = inlined_call_operand.vmem [shape: f32[128,64], index: 3, kind: input, shape index: {}]   ;;  %s1355_s4 = inlined_call_operand.vmem [shape: f32[1,64], index: 4, kind: input, shape index: {}]   ;;  %s1356_s5 = inlined_call_operand.hbm [shape: f32[2,64,256], index: 5, kind: output, shape index: {}]  }
   0x1   :  { %12 = vsyncpa [#allocation3 + $0x1], 0 }
   0x2   :  { %13 = vsyncpa [#allocation4], 0 }
   0x3   :  { %15 = vsyncpa [#allocation4 + $0x1], 0  ;;  %s1012_s18 = smov 0   ;;  %s1014_s19 = smov 0  }
   0x4   :  { %s1016_s20 = smov 0   ;;  %s1018_s21 = smov 0  }
   0x5 LB: > { %s1033_s22 = sadd.s32 4294967295, %s971_s21   ;;  %s684_s23 = sadd.s32 4294967294, %s971_s21   ;;  %s971_s21 = sphi %s1018_s21, %s1369_s21   ;;  %s967_s20 = sphi %s1016_s20, %s1368_s20   ;;  %s963_s19 = sphi %s1014_s19, %s1367_s19   ;;  %s959_s18 = sphi %s1012_s18, %s1366_s18  }
   0x6   : > { %s1037_s24 = sadd.s32 1, %s971_s21   ;;  %s28_s25 = sadd.s32 1, %s967_s20 }
   0x7   : > { %s25_s26 = ssub.s32 %s971_s21, %s1037_s24  ;;  %p35_p0 = scmp.ne.s32.totalorder %s967_s20, %s963_s19 }
   0x8   : > { %p26_p1 = scmp.eq.s32.totalorder %s25_s26, 0  ;;  %p36_p2 = scmp.eq.s32.totalorder %s971_s21, 0 }
   0x9   : > { %p41_p3 = scmp.ne.s32.totalorder %s963_s19, %s959_s18  ;;  %p42_p4 = scmp.eq.s32.totalorder %s1033_s22, 0 }
   0xa   : > { %s1049_s27 = scalar_select %p26_p1, %s967_s20, %s28_s25  }
   0xb   : > { %p1051_p5 = por %p36_p2, %p35_p0  ;;  %p1055_p6 = por %p42_p4, %p41_p3 }
   0xc   : > { %p149_p7 = scmp.eq.s32.totalorder %s1033_s22, 1  ;;  %p155_p8 = scmp.eq.s32.totalorder %s684_s23, 1 }
   0xd   : > { %p830_p10 = scmp.lt.s32.totalorder %s971_s21, 2  ;;  %s187_s7 = sand.u32 1, %s967_s20  }
   0xe   : > { %p1062_p11 = por %p149_p7, %p35_p0  ;;  %p1066_p12 = por %p155_p8, %p41_p3 }
   0xf   : > { %s700_s8 = sshll.u32 %s971_s21, 11  ;;  %s687_s9 = sshll.u32 %s187_s7, 7 }
  0x10   : > { %s1360_s30 = scalar_select %p1062_p11, 1, 0 }
  0x11   : > { %s1361_s6 = scalar_select %p1066_p12, 1, 0 }
  0x12   : > { %s1075_s12 = scalar_lea.hbm %s1351_s0, %s700_s8  ;;  %s191_s13 = scalar_lea.vmem [#allocation2], %s687_s9 }
  0x13   : > { %s198_s14 = sshll.u32 %s191_s13, 4  ;;  %p1079_p13 = pnand %p830_p10, %p1051_p5  ;;  %s1083_s14 = int_to_ptr.vmem [resolvable:$true] %s198_s14 }
  0x14   : > { %s1085_s16 = scalar_lea.sflag [#allocation3], %s187_s7  ;;  %s875_s17 = scalar_lea.hbm %s1075_s12, 2048 }
  0x15   : > { %p876_p0 = scmp.ne.s32.totalorder %s1075_s12, %s875_s17  ;;  %p877_p1 = pneg %p1079_p13 }
  0x16   : > { %s880_s26 = scalar_lea.hbm %s1351_s0, 4096  ;;  %p881_p4 = scmp.lt.u32.totalorder %s1075_s12, %s1351_s0 }
  0x17   : > { %p878_p2 = pnand %p877_p1, %p876_p0  ;;  %p882_p5 = scmp.lt.u32.totalorder %s880_s26, %s875_s17 }
  0x18   : > { %p884_p8 = scmp.lt.u32.totalorder %s875_s17, %s1075_s12 }
  0x19   : > { %p879_p3 = pneg %p878_p2  ;;  %p883_p7 = por %p882_p5, %p881_p4 }
  0x1b   : > { %p885_p10 = por %p884_p8, %p883_p7 }
  0x1d   : > { %p886_p9 = pnand %p885_p10, %p879_p3 }
  0x1f   : > { %889 = shalt.err (!%p886_p9)
}
  0x20   : > { %s890_s7 = scalar_lea.vmem %s1083_s14, 2048  ;;  %s973_s9 = smov [#allocation2]  }
  0x21   : > { %p891_p0 = scmp.ne.s32.totalorder %s1083_s14, %s890_s7  ;;  %s895_s10 = sshll.u32 %s973_s9, 4  ;;  %s896_s10 = int_to_ptr.vmem [resolvable:$false] %s895_s10 }
  0x22   : > { %s897_s11 = scalar_lea.vmem %s896_s10, 4096  ;;  %p898_p11 = scmp.lt.s32.totalorder %s1083_s14, %s896_s10 }
  0x23   : > { %p893_p2 = pnand %p891_p0, %p877_p1  ;;  %p899_p4 = scmp.lt.s32.totalorder %s897_s11, %s890_s7 }
  0x25   : > { %p894_p12 = pneg %p893_p2  ;;  %p900_p5 = por %p899_p4, %p898_p11 }
  0x27   : > { %p901_p7 = pnand %p900_p5, %p894_p12 }
  0x29   : > { %904 = shalt.err (!%p901_p7)
}
  0x2a   : > { %s974_s13 = smov 256   ;;  %s975_s17 = smov 16  }
  0x2b   : > { %825 = dma.hbm_to_vmem [thread:$0]  (!%p1079_p13), %s1075_s12, 2048, %s1083_s14, %s1085_s16, %s974_s13, %s974_s13, %s975_s17  }
  0x2c   : > { %p690_p9 = scmp.ge.s32.totalorder %s971_s21, 1  ;;  %p206_p1 = scmp.lt.s32.totalorder %s971_s21, 3 }
  0x2e   : > { %p207_p3 = pnand %p690_p9, %p206_p1 }
  0x2f   : > { %s1116_s23 = sand.u32 (!%p207_p3), 1, %s963_s19  }
  0x30   : > { %210 = sbr.rel (%p207_p3) target bundleno = 825 (0x339), region = 40  ;;  %s691_s25 = sshll.u32 (!%p207_p3), %s1116_s23, 7 }
  0x31   : > { %s213_s26 = scalar_lea.sflag (!%p207_p3), [#allocation3], %s1116_s23  ;;  %s216_s28 = scalar_lea.vmem (!%p207_p3), [#allocation2], %s691_s25 }
  0x37   : > { %950 = dma.done.wait (%p1055_p6), %s213_s26, 2048  }
  0x38   : > { %952 = vsyncadd (%p1055_p6), %s213_s26, 4294965248  ;;  %v1126_v0 = vld [vmem:[%s216_s28] sm:$0xff]  ;;  %v1128_v1 = vld [vmem:[%s216_s28 + $0x8] sm:$0xff]  ;;  %v976_v27 = vmov 0.0|0.0   ;;  %vm977_vm0 = vmmov 0   ;;  %v978_v37 = vmov 0.0   ;;  %v308_v59 = vlaneseq }
  0x39   : > { %v1130_v2 = vld [vmem:[%s216_s28 + $0x20] sm:$0xff]  ;;  %v259_v3 = vadd.f32 %v1128_v1, %v1126_v0  ;;  %v1134_v4 = vld [vmem:[%s216_s28 + $0x28] sm:$0xff]  ;;  %v1136_v5 = vld [vmem:[%s216_s28 + $0x10] sm:$0xff]  ;;  %782 = vmatprep.subr.bf16.mxu0 %v976_v27  ;;  %794 = vmatprep.subr.bf16.mxu1 %v976_v27  ;;  %vm319_vm1 = vcmask 130112   ;;  %vm326_vm2 = vcmask 195712   ;;  %vm333_vm3 = vcmask 261312  }
  0x3a   : > { %v1138_v6 = vld [vmem:[%s216_s28 + $0x18] sm:$0xff]  ;;  %v265_v7 = vadd.f32 %v1134_v4, %v1130_v2  ;;  %v1142_v8 = vld [vmem:[%s216_s28 + $0x30] sm:$0xff]  ;;  %v1150_v12 = vld [vmem:[%s216_s28 + $0x40] sm:$0xff]  ;;  %744 = vmatprep.mubr.msk.f32.mxu0 %vm977_vm0, %v978_v37  ;;  %779 = vmatprep.mubr.msk.f32.mxu1 %vm977_vm0, %v978_v37  ;;  %v309_v60 = vand.u32 127, %v308_v59  ;;  %v1240_v61 = vshrl.u32 %v308_v59, 7  ;;  %vm340_vm4 = vcmask 326912  }
  0x3b   : > { %v1144_v9 = vld [vmem:[%s216_s28 + $0x38] sm:$0xff]  ;;  %260 = vadd.xlane.f32.xlu0 %v259_v3  ;;  %v262_v10 = vadd.f32 %v1138_v6, %v1136_v5  ;;  %v1152_v13 = vld [vmem:[%s216_s28 + $0x48] sm:$0xff]  ;;  %v1154_v14 = vld [vmem:[%s216_s28 + $0x50] sm:$0xff]  ;;  %vm347_vm5 = vcmask 392512   ;;  %vm354_vm6 = vcmask 458112   ;;  %vm361_vm7 = vcmask 523712  }
  0x3c   : > { %266 = vadd.xlane.f32.xlu1 %v265_v7  ;;  %v268_v11 = vadd.f32 %v1144_v9, %v1142_v8  ;;  %v1156_v15 = vld [vmem:[%s216_s28 + $0x58] sm:$0xff]  ;;  %v271_v16 = vadd.f32 %v1152_v13, %v1150_v12  ;;  %v1162_v18 = vld [vmem:[%s216_s28 + $0x60] sm:$0xff]  ;;  %v1164_v19 = vld [vmem:[%s216_s28 + $0x68] sm:$0xff]  ;;  %v314_v62 = vadd.s32 4294967288, %v309_v60  ;;  %v321_v3 = vadd.s32 4294967280, %v309_v60  ;;  %s1270_s13 = scalar_lea.vmem [#allocation5], %s691_s25 }
  0x3d   : > { %v274_v17 = vadd.f32 %v1156_v15, %v1154_v14  ;;  %v1166_v20 = vld [vmem:[%s216_s28 + $0x70] sm:$0xff]  ;;  %v1168_v21 = vld [vmem:[%s216_s28 + $0x78] sm:$0xff]  ;;  %v277_v22 = vadd.f32 %v1164_v19, %v1162_v18  ;;  %v291_v24 = vld [vmem:[%s1352_s1] sm:$0xff]  ;;  %v328_v7 = vadd.s32 4294967272, %v309_v60  ;;  %vm363_vm8 = vcmask 523264   ;;  %s701_s25 = sshll.u32 %s1033_s22, 11 }
  0x3e   : > { %v280_v23 = vadd.f32 %v1168_v21, %v1166_v20  ;;  %v292_v25 = vld [vmem:[%s1352_s1 + $0x8] sm:$0xff]  ;;  %v293_v28 = vld [vmem:[%s1352_s1 + $0x10] sm:$0xff]  ;;  %v294_v29 = vld [vmem:[%s1352_s1 + $0x18] sm:$0xff]  ;;  %s611_s17 = sshll.u32 %s1270_s13, 4  ;;  %s1301_s29 = scalar_lea.hbm %s1356_s5, %s701_s25  ;;  %s1303_s17 = int_to_ptr.vmem [resolvable:$true] %s611_s17 }
  0x3f   : > { %263 = vadd.xlane.f32.xlu0 %v262_v10  ;;  %v783_v26 = vpack.c.bf16 %v292_v25, %v291_v24  ;;  %v786_v30 = vpack.c.bf16 %v294_v29, %v293_v28  ;;  %v295_v31 = vld [vmem:[%s1352_s1 + $0x20] sm:$0xff]  ;;  %v296_v32 = vld [vmem:[%s1352_s1 + $0x28] sm:$0xff]  ;;  %v297_v34 = vld [vmem:[%s1352_s1 + $0x30] sm:$0xff]  ;;  %s598_s22 = scalar_lea.sflag [#allocation4], %s1116_s23  ;;  %s905_s12 = scalar_lea.vmem %s1303_s17, 2048 }
  0x40   : > { %269 = vadd.xlane.f32.xlu1 %v268_v11  ;;  %v789_v33 = vpack.c.bf16 %v296_v32, %v295_v31  ;;  %v298_v35 = vld [vmem:[%s1352_s1 + $0x38] sm:$0xff]  ;;  %v437_v38 = vld [vmem:[%s1354_s3] sm:$0xff]  ;;  %v438_v39 = vld [vmem:[%s1354_s3 + $0x8] sm:$0xff]  ;;  %v312_v11 = vsub.s32 %v309_v60, %v1240_v61  ;;  %p906_p6 = scmp.ne.s32.totalorder %s1303_s17, %s905_s12  ;;  %p1363_p11 = scmp.ne.s32.totalorder %s1360_s30, 0 }
  0x41   : > { %784 = vmatpush3.bf16.msra.mxu0 %v783_v26  ;;  %v792_v36 = vpack.c.bf16 %v298_v35, %v297_v34  ;;  %v439_v40 = vld [vmem:[%s1354_s3 + $0x10] sm:$0xff]  ;;  %v795_v41 = vpack.c.bf16 %v438_v39, %v437_v38  ;;  %v440_v42 = vld [vmem:[%s1354_s3 + $0x18] sm:$0xff]  ;;  %v441_v44 = vld [vmem:[%s1354_s3 + $0x20] sm:$0xff]  ;;  %v331_v26 = vsub.s32 %v328_v7, %v1240_v61  ;;  %v349_v34 = vadd.s32 4294967248, %v309_v60  ;;  %s979_s14 = smov [#allocation5]  }
  0x42   : > { %785 = vmatprep.subr.bf16.mxu0 %v976_v27  ;;  %v798_v43 = vpack.c.bf16 %v440_v42, %v439_v40  ;;  %v442_v45 = vld [vmem:[%s1354_s3 + $0x28] sm:$0xff]  ;;  %v443_v47 = vld [vmem:[%s1354_s3 + $0x30] sm:$0xff]  ;;  %v444_v48 = vld [vmem:[%s1354_s3 + $0x38] sm:$0xff]  ;;  %v356_v39 = vadd.s32 4294967240, %v309_v60  ;;  %p907_p12 = pnand %p906_p6, %p1363_p11  ;;  %s909_s15 = sshll.u32 %s979_s14, 4  ;;  %s910_s15 = int_to_ptr.vmem [resolvable:$false] %s909_s15 }
  0x43   : > { %272 = vadd.xlane.f32.xlu0 %v271_v16  ;;  %796 = vmatpush3.bf16.msra.mxu1 %v795_v41  ;;  %v801_v46 = vpack.c.bf16 %v442_v45, %v441_v44  ;;  %v804_v49 = vpack.c.bf16 %v444_v48, %v443_v47  ;;  %v445_v50 = vld [vmem:[%s1354_s3 + $0x40] sm:$0xff]  ;;  %v446_v51 = vld [vmem:[%s1354_s3 + $0x48] sm:$0xff]  ;;  %v447_v53 = vld [vmem:[%s1354_s3 + $0x50] sm:$0xff]  ;;  %v352_v47 = vsub.s32 %v349_v34, %v1240_v61  ;;  %s911_s16 = scalar_lea.vmem %s910_s15, 4096  ;;  %p912_p8 = scmp.lt.s32.totalorder %s1303_s17, %s910_s15 }
  0x44   : > { %275 = vadd.xlane.f32.xlu1 %v274_v17  ;;  %797 = vmatprep.subr.bf16.mxu1 %v976_v27  ;;  %v807_v52 = vpack.c.bf16 %v446_v51, %v445_v50  ;;  %v448_v54 = vld [vmem:[%s1354_s3 + $0x58] sm:$0xff]  ;;  %v449_v56 = vld [vmem:[%s1354_s3 + $0x60] sm:$0xff]  ;;  %v450_v57 = vld [vmem:[%s1354_s3 + $0x68] sm:$0xff]  ;;  %v317_v17 = vsub.s32 %v314_v62, %v1240_v61  ;;  %v359_v50 = vsub.s32 %v356_v39, %v1240_v61  ;;  %p908_p13 = pneg %p907_p12  ;;  %p913_p10 = scmp.lt.s32.totalorder %s911_s16, %s905_s12 }
  0x45   : > { %787 = vmatpush3.bf16.msra.mxu0 %v786_v30  ;;  %v810_v55 = vpack.c.bf16 %v448_v54, %v447_v53  ;;  %v813_v58 = vpack.c.bf16 %v450_v57, %v449_v56  ;;  %v452_v62 = vld [vmem:[%s1354_s3 + $0x78] sm:$0xff] }
  0x46   : > { %788 = vmatprep.subr.bf16.mxu0 %v976_v27  ;;  %p914_p0 = por %p913_p10, %p912_p8 }
  0x47   : > { %278 = vadd.xlane.f32.xlu0 %v277_v22  ;;  %799 = vmatpush3.bf16.msra.mxu1 %v798_v43  ;;  %v335_v22 = vadd.s32 4294967264, %v309_v60 }
  0x48   : > { %281 = vadd.xlane.f32.xlu1 %v280_v23  ;;  %800 = vmatprep.subr.bf16.mxu1 %v976_v27  ;;  %v324_v23 = vsub.s32 %v321_v3, %v1240_v61  ;;  %v299_v3 = vld [vmem:[%s1353_s2] sm:$0x1]  ;;  %p915_p2 = pnand %p914_p0, %p908_p13 }
  0x49   : > { %790 = vmatpush3.bf16.msra.mxu0 %v789_v33  ;;  %v338_v33 = vsub.s32 %v335_v22, %v1240_v61 }
  0x4a   : > { %791 = vmatprep.subr.bf16.mxu0 %v976_v27 }
  0x4b   : > { %802 = vmatpush3.bf16.msra.mxu1 %v801_v46 }
  0x4c   : > { %803 = vmatprep.subr.bf16.mxu1 %v976_v27 }
  0x4d   : > { %793 = vmatpush3.bf16.msra.mxu0 %v792_v36 }
  0x4f   : > { %805 = vmatpush3.bf16.msra.mxu1 %v804_v49 }
  0x50   : > { %806 = vmatprep.subr.bf16.mxu1 %v976_v27 }
  0x53   : > { %808 = vmatpush3.bf16.msra.mxu1 %v807_v52 }
  0x54   : > { %809 = vmatprep.subr.bf16.mxu1 %v976_v27 }
  0x57   : > { %811 = vmatpush3.bf16.msra.mxu1 %v810_v55 }
  0x58   : > { %812 = vmatprep.subr.bf16.mxu1 %v976_v27 }
  0x5b   : > { %814 = vmatpush3.bf16.msra.mxu1 %v813_v58 }
  0x5c   : > { %815 = vmatprep.subr.bf16.mxu1 %v976_v27  ;;  %v342_v27 = vadd.s32 4294967256, %v309_v60  ;;  %v451_v60 = vld [vmem:[%s1354_s3 + $0x70] sm:$0xff] }
  0x5e   : > { %v345_v38 = vsub.s32 %v342_v27, %v1240_v61 }
  0xc8   : > { %v261_v63 = vpop.xlane.xlu0 %260 }
  0xc9   : > { %v267_v10 = vpop.xlane.xlu1 %266  ;;  %v283_v16 = vmul.f32 0.00390625, %v261_v63  ;;  %v816_v63 = vpack.c.bf16 %v452_v62, %v451_v60 }
  0xca   : > { %v285_v24 = vmul.f32 0.00390625, %v267_v10 }
  0xcb   : > { %v313_v31 = vrot.slane %v283_v16, %v312_v11  ;;  %817 = vmatpush3.bf16.msra.mxu1 %v816_v63 }
  0xcc   : > { %v264_v25 = vpop.xlane.xlu0 %263  ;;  %v325_v35 = vrot.slane %v285_v24, %v324_v23 }
  0xcd   : > { %v284_v28 = vmul.f32 0.00390625, %v264_v25  ;;  %v270_v29 = vpop.xlane.xlu1 %269 }
  0xce   : > { %v286_v30 = vmul.f32 0.00390625, %v270_v29 }
  0xcf   : > { %v318_v32 = vrot.slane %v284_v28, %v317_v17  ;;  %v453_v17 = vld [vmem:[%s1355_s4] sm:$0x1]  ;;  %v532_v28 = vsub.s32 0, %v1240_v61 }
  0xd0   : > { %v332_v36 = vrot.slane %v286_v30, %v331_v26  ;;  %v273_v37 = vpop.xlane.xlu0 %272 }
  0xd1   : > { %v320_v40 = vsel %vm319_vm1, %v318_v32, %v313_v31  ;;  %v287_v41 = vmul.f32 0.00390625, %v273_v37  ;;  %v276_v42 = vpop.xlane.xlu1 %275 }
  0xd2   : > { %v327_v43 = vsel %vm326_vm2, %v325_v35, %v320_v40  ;;  %v288_v44 = vmul.f32 0.00390625, %v276_v42 }
  0xd3   : > { %v334_v45 = vsel %vm333_vm3, %v332_v36, %v327_v43  ;;  %v339_v46 = vrot.slane %v287_v41, %v338_v33 }
  0xd4   : > { %v346_v48 = vrot.slane %v288_v44, %v345_v38  ;;  %v279_v49 = vpop.xlane.xlu0 %278 }
  0xd5   : > { %v341_v51 = vsel %vm340_vm4, %v339_v46, %v334_v45  ;;  %v289_v52 = vmul.f32 0.00390625, %v279_v49  ;;  %v282_v53 = vpop.xlane.xlu1 %281 }
  0xd6   : > { %v290_v54 = vmul.f32 0.00390625, %v282_v53  ;;  %v348_v56 = vsel %vm347_vm5, %v346_v48, %v341_v51 }
  0xd7   : > { %v353_v55 = vrot.slane %v289_v52, %v352_v47 }
  0xd8   : > { %v360_v57 = vrot.slane %v290_v54, %v359_v50 }
  0xd9   : > { %v355_v58 = vsel %vm354_vm6, %v353_v55, %v348_v56 }
  0xda   : > { %v362_v59 = vsel %vm361_vm7, %v360_v57, %v355_v58 }
  0xdb   : > { %745 = vmatmul.mubr.msk.f32.vlgmr.msra.gmra.mrb[0].mxu0 %vm363_vm8, %v362_v59 }
 0x1ae   : > { %v432_v7 = vpop.f32.mrb[0].mxu0 }
 0x1af   : > { %v433_v10 = vadd.f32 %v432_v7, %v299_v3  ;;  %v746_v11 = vpop.f32.mrb[1].mxu0 }
 0x1b1   : > { %v436_v16 = vmax.f32 %v433_v10, 0.0 }
 0x1b3   : > { %780 = vmatmul.mubr.f32.vlgmr.msra.gmra.mrb[0].mxu1 %v436_v16 }
 0x286   : > { %v520_v22 = vpop.f32.mrb[0].mxu1 }
 0x287   : > { %v521_v23 = vadd.f32 %v520_v22, %v453_v17  ;;  %v781_v24 = vpop.f32.mrb[1].mxu1 }
 0x289   : > { %v694_v25 = vmul.f32 -1.442695, %v521_v23 }
 0x28b   : > { %871 = vpow2.f32 %v694_v25 }
 0x295   : > { %v872_v26 = vpop.eup %871 }
 0x296   : > { %v527_v27 = vadd.f32 1.0, %v872_v26 }
 0x298   : > { %873 = vrcp.f32 %v527_v27 }
 0x2a2   : > { %v874_v29 = vpop.eup %873 }
 0x2a3   : > { %v533_v30 = vrot.slane %v874_v29, %v532_v28 }
 0x2a5   : > { %539 = vbcast.lane.b32.xlu1 %v533_v30, 264  ;;  %535 = vbcast.lane.b32.xlu0 %v533_v30, 256 }
 0x2a9   : > { %543 = vbcast.lane.b32.xlu1 %v533_v30, 272  ;;  %551 = vbcast.lane.b32.xlu0 %v533_v30, 288 }
 0x2ad   : > { %547 = vbcast.lane.b32.xlu1 %v533_v30, 280  ;;  %559 = vbcast.lane.b32.xlu0 %v533_v30, 304 }
 0x2b1   : > { %555 = vbcast.lane.b32.xlu1 %v533_v30, 296 }
 0x2b5   : > { %563 = vbcast.lane.b32.xlu1 %v533_v30, 312 }
 0x317   : > { %v540_v31 = vpop.permute.xlu1 %539  ;;  %v536_v32 = vpop.permute.xlu0 %535 }
 0x318   : > { %v567_v33 = vmul.f32 %v540_v31, %v1136_v5  ;;  %v568_v34 = vmul.f32 %v540_v31, %v1138_v6  ;;  %v565_v35 = vmul.f32 %v536_v32, %v1126_v0  ;;  %v566_v61 = vmul.f32 %v536_v32, %v1128_v1 }
 0x31a   : > { %583 = vst [vmem:[%s1270_s13 + $0x10] sm:$0xff] %v567_v33  ;;  %584 = vst [vmem:[%s1270_s13 + $0x18] sm:$0xff] %v568_v34 }
 0x31b   : > { %581 = vst [vmem:[%s1270_s13] sm:$0xff] %v565_v35  ;;  %582 = vst [vmem:[%s1270_s13 + $0x8] sm:$0xff] %v566_v61  ;;  %v544_v5 = vpop.permute.xlu1 %543  ;;  %v552_v0 = vpop.permute.xlu0 %551 }
 0x31c   : > { %v569_v1 = vmul.f32 %v544_v5, %v1130_v2  ;;  %v570_v6 = vmul.f32 %v544_v5, %v1134_v4  ;;  %v573_v36 = vmul.f32 %v552_v0, %v1150_v12  ;;  %v574_v37 = vmul.f32 %v552_v0, %v1152_v13 }
 0x31e   : > { %585 = vst [vmem:[%s1270_s13 + $0x20] sm:$0xff] %v569_v1  ;;  %586 = vst [vmem:[%s1270_s13 + $0x28] sm:$0xff] %v570_v6 }
 0x31f   : > { %589 = vst [vmem:[%s1270_s13 + $0x40] sm:$0xff] %v573_v36  ;;  %590 = vst [vmem:[%s1270_s13 + $0x48] sm:$0xff] %v574_v37  ;;  %v548_v38 = vpop.permute.xlu1 %547  ;;  %v560_v39 = vpop.permute.xlu0 %559 }
 0x320   : > { %v571_v2 = vmul.f32 %v548_v38, %v1142_v8  ;;  %v572_v40 = vmul.f32 %v548_v38, %v1144_v9  ;;  %v577_v4 = vmul.f32 %v560_v39, %v1162_v18  ;;  %v578_v12 = vmul.f32 %v560_v39, %v1164_v19 }
 0x322   : > { %587 = vst [vmem:[%s1270_s13 + $0x30] sm:$0xff] %v571_v2  ;;  %588 = vst [vmem:[%s1270_s13 + $0x38] sm:$0xff] %v572_v40 }
 0x323   : > { %593 = vst [vmem:[%s1270_s13 + $0x60] sm:$0xff] %v577_v4  ;;  %594 = vst [vmem:[%s1270_s13 + $0x68] sm:$0xff] %v578_v12  ;;  %v556_v13 = vpop.permute.xlu1 %555 }
 0x324   : > { %v575_v41 = vmul.f32 %v556_v13, %v1154_v14  ;;  %v576_v42 = vmul.f32 %v556_v13, %v1156_v15 }
 0x326   : > { %591 = vst [vmem:[%s1270_s13 + $0x50] sm:$0xff] %v575_v41  ;;  %592 = vst [vmem:[%s1270_s13 + $0x58] sm:$0xff] %v576_v42 }
 0x327   : > { %v564_v8 = vpop.permute.xlu1 %563 }
 0x328   : > { %v579_v9 = vmul.f32 %v564_v8, %v1166_v20  ;;  %v580_v14 = vmul.f32 %v564_v8, %v1168_v21 }
 0x32a   : > { %595 = vst [vmem:[%s1270_s13 + $0x70] sm:$0xff] %v579_v9  ;;  %596 = vst [vmem:[%s1270_s13 + $0x78] sm:$0xff] %v580_v14 }
 0x32b   : > { %918 = shalt.err (!%p915_p2)
}
 0x32c   : > { %s919_s8 = scalar_lea.hbm %s1301_s29, 2048  ;;  %s923_s10 = scalar_lea.hbm %s1356_s5, 4096 }
 0x32d   : > { %p920_p4 = scmp.ne.s32.totalorder %s1301_s29, %s919_s8  ;;  %p924_p9 = scmp.lt.u32.totalorder %s1301_s29, %s1356_s5 }
 0x32e   : > { %p925_p1 = scmp.lt.u32.totalorder %s923_s10, %s919_s8  ;;  %p927_p6 = scmp.lt.u32.totalorder %s919_s8, %s1301_s29 }
 0x32f   : > { %p921_p5 = pnand %p920_p4, %p1363_p11 }
 0x330   : > { %p926_p3 = por %p925_p1, %p924_p9 }
 0x331   : > { %p922_p7 = pneg %p921_p5 }
 0x332   : > { %p928_p12 = por %p927_p6, %p926_p3 }
 0x334   : > { %p929_p13 = pnand %p928_p12, %p922_p7 }
 0x336   : > { %932 = shalt.err (!%p929_p13)
}
 0x337   : > { %s980_s25 = smov 256   ;;  %s981_s26 = smov 16  }
 0x338   : > { %820 = dma.vmem_to_hbm [thread:$0]  (%p1363_p11), %s1303_s17, 2048, %s1301_s29, %s598_s22, %s980_s25, %s980_s25, %s981_s26  }
 0x339 PF: > { %s626_s28 = sand.u32 1, %s959_s18   ;;  %p1364_p8 = scmp.ne.s32.totalorder %s1361_s6, 0 }
 0x33a   : > { %p1365_p10 = scmp.ge.s32.totalorder %s971_s21, 2  ;;  %s627_s12 = scalar_lea.sflag [#allocation4], %s626_s28 }
 0x33c   : > { %p827_p0 = pnand %p1365_p10, %p1364_p8 }
 0x33e   : > { %954 = dma.done.wait (!%p827_p0), %s627_s12, 2048  }
 0x33f   : > { %956 = vsyncadd (!%p827_p0), %s627_s12, 4294965248  ;;  %p18_p2 = scmp.ge.s32.totalorder %s1037_s24, 4   ;;  %s1366_s18 = smov %s963_s19 }
 0x340   : > { %s1367_s19 = smov %s967_s20  ;;  %s1368_s20 = smov %s1049_s27 }
 0x341   : > { %s1369_s21 = smov %s1037_s24  ;;  %20 = sbr.rel (!%p18_p2) target bundleno = 5 (0x5), region = 85 }
 0x348   :  { %632 = vsyncpa [#allocation3], 1 }
 0x349   :  { %634 = vsyncpa [#allocation3 + $0x1], 1 }
 0x34a   :  { %635 = vsyncpa [#allocation4], 1 }
 0x34b   :  { %637 = vsyncpa [#allocation4 + $0x1], 1 }

</bundles_post_ra>
